<compile_context>
chip_gen: v5e
topology: v5e:2x2
jax: 0.10.0
libtpu: 0.0.40
codegen_flags: <defaults>
</compile_context>

<pallas_src>
import functools

import jax
import jax.numpy as jnp
from jax.experimental import pallas as pl
from jax.experimental.pallas import tpu as pltpu

NUM_FEATURES = 128   # forced by the module's own forward-pass shape constraints
HIDDEN = 128
NUM_LAYERS = 5


def _dnn_kernel(x_ref, w_ref, b_ref, o_ref, *, elementwise_bf16):
    # x_ref: (TM, 128)            w_ref: (5, 128, 128) bf16 (VMEM-resident)
    # b_ref: (5, 1, 128)          o_ref: (TM, 128) bf16
    if elementwise_bf16:
        # v6e/v7x: bf16-native VPU -> keep activation, bias add and ReLU in bf16.
        # No explicit f32->bf16 cast per layer: the MXU result pops as bf16.
        h = x_ref[...].astype(jnp.bfloat16)
        for layer in range(NUM_LAYERS):            # static, fully unrolled
            y = jnp.dot(h, w_ref[layer], preferred_element_type=jnp.bfloat16)
            h = jnp.maximum(y + b_ref[layer], 0.0)  # stays bf16 (weak-typed 0.0)
    else:
        # v5e: no bf16 VALU -> elementwise path in f32; only MXU operands are bf16.
        h = x_ref[...].astype(jnp.float32)
        for layer in range(NUM_LAYERS):
            y = jnp.dot(h.astype(jnp.bfloat16), w_ref[layer],
                        preferred_element_type=jnp.float32)
            h = jnp.maximum(y + b_ref[layer], 0.0)
    o_ref[...] = h.astype(o_ref.dtype)


def _round_up(v, m):
    return -(-v // m) * m


@functools.partial(jax.jit, static_argnames=("tm", "elementwise_bf16"))
def dnn_forward(x, w_stack, b_stack, *, tm=4096, elementwise_bf16=True):
    B, F = x.shape
    assert F == NUM_FEATURES, "forward() only type-checks for num_features == 128"

    # Weights should already be stored bf16 (init_params does this); astype is a
    # no-op then. Bias is 5*128 elems (2.5 KiB) -> per-call convert is noise.
    w = w_stack.astype(jnp.bfloat16)
    b = b_stack.astype(jnp.bfloat16 if elementwise_bf16 else jnp.float32)

    # Tile: at most tm, at most ~B/2 (>=2 grid steps so v7x's two TCs both get
    # work), a multiple of 8 sublanes, at least 8.
    half_up = max(8, _round_up(max(B // 2, 1), 8))
    tm_eff = max(8, min(tm, half_up))
    grid = (pl.cdiv(B, tm_eff),)
    b_pad = grid[0] * tm_eff
    if b_pad != B:
        # Zero-pad the batch to a tile multiple; zeros flow harmlessly through
        # Linear+ReLU and the padded rows are sliced off below.
        x = jnp.pad(x, ((0, b_pad - B), (0, 0)))

    cost = pl.CostEstimate(
        flops=2 * b_pad * NUM_FEATURES * HIDDEN * NUM_LAYERS,
        bytes_accessed=(b_pad * NUM_FEATURES * x.dtype.itemsize   # x in
                        + b_pad * HIDDEN * 2                       # out (bf16)
                        + w.size * 2 + b.size * b.dtype.itemsize), # params
        transcendentals=0,
    )

    out = pl.pallas_call(
        functools.partial(_dnn_kernel, elementwise_bf16=elementwise_bf16),
        out_shape=jax.ShapeDtypeStruct((b_pad, HIDDEN), jnp.bfloat16),
        grid=grid,
        in_specs=[
            # Activations: batch-tiled -> pipelined HBM<->VMEM DMA per grid step.
            pl.BlockSpec((tm_eff, NUM_FEATURES), lambda i: (i, 0)),
            # Weights/biases: constant index_map -> DMA'd once, VMEM-resident.
            pl.BlockSpec((NUM_LAYERS, NUM_FEATURES, HIDDEN), lambda i: (0, 0, 0)),
            pl.BlockSpec((NUM_LAYERS, 1, HIDDEN), lambda i: (0, 0, 0)),
        ],
        out_specs=pl.BlockSpec((tm_eff, HIDDEN), lambda i: (i, 0)),
        compiler_params=pltpu.CompilerParams(
            dimension_semantics=("parallel",)),   # megacore sharding on v7x
        cost_estimate=cost,
    )(x, w, b)
    return out[:B]


def init_params(key):
    """nn.Linear-style uniform(-1/sqrt(in), 1/sqrt(in)) init.

    Weights are stored bf16 once (hoisted cast -> no per-call convert / HBM
    re-stream); biases stay f32 (tiny; cast per elementwise path in the wrapper).
    """
    ws, bs = [], []
    bound = 1.0 / float(NUM_FEATURES) ** 0.5
    for _ in range(NUM_LAYERS):
        key, kw, kb = jax.random.split(key, 3)
        # PyTorch stores (out, in); we keep (in, out) so the kernel does x @ W.
        w = jax.random.uniform(kw, (NUM_FEATURES, HIDDEN), jnp.float32,
                               minval=-bound, maxval=bound)
        b_ = jax.random.uniform(kb, (1, HIDDEN), jnp.float32,
                                minval=-bound, maxval=bound)
        ws.append(w)
        bs.append(b_)
    return jnp.stack(ws).astype(jnp.bfloat16), jnp.stack(bs)


def reference_forward(x, w_stack, b_stack, *, elementwise_bf16):
    """Pure-JAX reference doing the same mixed-precision math as the kernel."""
    w = w_stack.astype(jnp.bfloat16)
    if elementwise_bf16:
        h = x.astype(jnp.bfloat16)
        b = b_stack.astype(jnp.bfloat16)
        for l in range(NUM_LAYERS):
            y = jnp.dot(h, w[l], preferred_element_type=jnp.bfloat16)
            h = jnp.maximum(y + b[l], 0.0)
    else:
        h = x.astype(jnp.float32)
        b = b_stack.astype(jnp.float32)
        for l in range(NUM_LAYERS):
            y = jnp.dot(h.astype(jnp.bfloat16), w[l],
                        preferred_element_type=jnp.float32)
            h = jnp.maximum(y + b[l], 0.0)
    return h.astype(jnp.bfloat16)


def _prefer_bf16_elementwise():
    """bf16-native VPU on v6e/v7x; v5e and older keep the f32 elementwise path."""
    try:
        kind = jax.devices()[0].device_kind.lower()
    except Exception:
        return False
    return ("v6" in kind) or ("v7" in kind)


if __name__ == "__main__":
    key = jax.random.PRNGKey(0)
    kx, kp = jax.random.split(key)

    # Small demo batch; num_features is forced to 128 by the module's forward.
    # Producer emits bf16 so the kernel streams bf16 activations over HBM.
    B = 256
    x = jax.random.normal(kx, (B, NUM_FEATURES), jnp.float32).astype(jnp.bfloat16)
    w_stack, b_stack = init_params(kp)

    ew_bf16 = _prefer_bf16_elementwise()

    out = dnn_forward(x, w_stack, b_stack, elementwise_bf16=ew_bf16)
    out = jax.block_until_ready(out)
    assert out.shape == (B, HIDDEN) and out.dtype == jnp.bfloat16

    ref = reference_forward(x, w_stack, b_stack, elementwise_bf16=ew_bf16)
    assert jnp.allclose(out.astype(jnp.float32), ref.astype(jnp.float32),
                        atol=2e-2, rtol=2e-2), "mismatch vs JAX reference"

    # Exercise the padded-tail path (batch not a multiple of the tile / of 8).
    B2 = 50
    x2 = jax.random.normal(kx, (B2, NUM_FEATURES), jnp.float32).astype(jnp.bfloat16)
    out2 = jax.block_until_ready(
        dnn_forward(x2, w_stack, b_stack, elementwise_bf16=ew_bf16))
    ref2 = reference_forward(x2, w_stack, b_stack, elementwise_bf16=ew_bf16)
    assert out2.shape == (B2, HIDDEN)
    assert jnp.allclose(out2.astype(jnp.float32), ref2.astype(jnp.float32),
                        atol=2e-2, rtol=2e-2), "mismatch vs JAX reference (padded)"

    print("KERNEL_OK")
</pallas_src>

<mosaic_0001>
module attributes {stable_mosaic.version = 11 : i64} {
  func.func @_dnn_kernel(%arg0: i32, %arg1: memref<128x128xbf16, #tpu.memory_space<vmem>>, %arg2: memref<5x128x128xbf16, #tpu.memory_space<vmem>>, %arg3: memref<5x1x128xf32, #tpu.memory_space<vmem>>, %arg4: memref<128x128xbf16, #tpu.memory_space<vmem>>) attributes {dimension_semantics = [#tpu.dimension_semantics<parallel>], iteration_bounds = array<i64: 2>, scalar_prefetch = 0 : i64, scratch_operands = 0 : i64, tpu.core_type = #tpu.core_type<tc>, window_params = [{transform_indices = @transform_0, window_bounds = array<i64: 128, 128>}, {pipeline_mode = #tpu.pipeline_mode<synchronous>, transform_indices = @transform_1, window_bounds = array<i64: 5, 128, 128>}, {pipeline_mode = #tpu.pipeline_mode<synchronous>, transform_indices = @transform_2, window_bounds = array<i64: 5, 1, 128>}, {transform_indices = @transform_3, window_bounds = array<i64: 128, 128>}]} {
    %c0 = arith.constant 0 : index
    %c0_0 = arith.constant 0 : index
    %0 = vector.load %arg1[%c0, %c0_0] : memref<128x128xbf16, #tpu.memory_space<vmem>>, vector<128x128xbf16>
    %1 = arith.extf %0 : vector<128x128xbf16> to vector<128x128xf32>
    %2 = arith.truncf %1 : vector<128x128xf32> to vector<128x128xbf16>
    %c0_1 = arith.constant 0 : index
    %c0_2 = arith.constant 0 : index
    %c0_3 = arith.constant 0 : index
    %3 = vector.load %arg2[%c0_1, %c0_2, %c0_3] : memref<5x128x128xbf16, #tpu.memory_space<vmem>>, vector<1x128x128xbf16>
    %4 = vector.shape_cast %3 : vector<1x128x128xbf16> to vector<128x128xbf16>
    %cst = arith.constant dense<0.000000e+00> : vector<128x128xf32>
    %5 = tpu.matmul %2, %4, %cst {dimension_numbers = #tpu.dot_dimension_numbers<[1], [0], [0], [1], [0, 0, 1, 1], [], []>} : vector<128x128xbf16>, vector<128x128xbf16>, vector<128x128xf32> -> vector<128x128xf32>
    %c0_4 = arith.constant 0 : index
    %c0_5 = arith.constant 0 : index
    %c0_6 = arith.constant 0 : index
    %6 = vector.load %arg3[%c0_4, %c0_5, %c0_6] : memref<5x1x128xf32, #tpu.memory_space<vmem>>, vector<1x1x128xf32>
    %7 = vector.shape_cast %6 : vector<1x1x128xf32> to vector<1x128xf32>
    %8 = vector.broadcast %7 : vector<1x128xf32> to vector<128x128xf32>
    %9 = arith.addf %5, %8 : vector<128x128xf32>
    %cst_7 = arith.constant 0.000000e+00 : f32
    %10 = vector.broadcast %cst_7 : f32 to vector<128x128xf32>
    %11 = arith.maximumf %9, %10 : vector<128x128xf32>
    %12 = arith.truncf %11 : vector<128x128xf32> to vector<128x128xbf16>
    %c1 = arith.constant 1 : index
    %c0_8 = arith.constant 0 : index
    %c0_9 = arith.constant 0 : index
    %13 = vector.load %arg2[%c1, %c0_8, %c0_9] : memref<5x128x128xbf16, #tpu.memory_space<vmem>>, vector<1x128x128xbf16>
    %14 = vector.shape_cast %13 : vector<1x128x128xbf16> to vector<128x128xbf16>
    %cst_10 = arith.constant dense<0.000000e+00> : vector<128x128xf32>
    %15 = tpu.matmul %12, %14, %cst_10 {dimension_numbers = #tpu.dot_dimension_numbers<[1], [0], [0], [1], [0, 0, 1, 1], [], []>} : vector<128x128xbf16>, vector<128x128xbf16>, vector<128x128xf32> -> vector<128x128xf32>
    %c1_11 = arith.constant 1 : index
    %c0_12 = arith.constant 0 : index
    %c0_13 = arith.constant 0 : index
    %16 = vector.load %arg3[%c1_11, %c0_12, %c0_13] : memref<5x1x128xf32, #tpu.memory_space<vmem>>, vector<1x1x128xf32>
    %17 = vector.shape_cast %16 : vector<1x1x128xf32> to vector<1x128xf32>
    %18 = vector.broadcast %17 : vector<1x128xf32> to vector<128x128xf32>
    %19 = arith.addf %15, %18 : vector<128x128xf32>
    %cst_14 = arith.constant 0.000000e+00 : f32
    %20 = vector.broadcast %cst_14 : f32 to vector<128x128xf32>
    %21 = arith.maximumf %19, %20 : vector<128x128xf32>
    %22 = arith.truncf %21 : vector<128x128xf32> to vector<128x128xbf16>
    %c2 = arith.constant 2 : index
    %c0_15 = arith.constant 0 : index
    %c0_16 = arith.constant 0 : index
    %23 = vector.load %arg2[%c2, %c0_15, %c0_16] : memref<5x128x128xbf16, #tpu.memory_space<vmem>>, vector<1x128x128xbf16>
    %24 = vector.shape_cast %23 : vector<1x128x128xbf16> to vector<128x128xbf16>
    %cst_17 = arith.constant dense<0.000000e+00> : vector<128x128xf32>
    %25 = tpu.matmul %22, %24, %cst_17 {dimension_numbers = #tpu.dot_dimension_numbers<[1], [0], [0], [1], [0, 0, 1, 1], [], []>} : vector<128x128xbf16>, vector<128x128xbf16>, vector<128x128xf32> -> vector<128x128xf32>
    %c2_18 = arith.constant 2 : index
    %c0_19 = arith.constant 0 : index
    %c0_20 = arith.constant 0 : index
    %26 = vector.load %arg3[%c2_18, %c0_19, %c0_20] : memref<5x1x128xf32, #tpu.memory_space<vmem>>, vector<1x1x128xf32>
    %27 = vector.shape_cast %26 : vector<1x1x128xf32> to vector<1x128xf32>
    %28 = vector.broadcast %27 : vector<1x128xf32> to vector<128x128xf32>
    %29 = arith.addf %25, %28 : vector<128x128xf32>
    %cst_21 = arith.constant 0.000000e+00 : f32
    %30 = vector.broadcast %cst_21 : f32 to vector<128x128xf32>
    %31 = arith.maximumf %29, %30 : vector<128x128xf32>
    %32 = arith.truncf %31 : vector<128x128xf32> to vector<128x128xbf16>
    %c3 = arith.constant 3 : index
    %c0_22 = arith.constant 0 : index
    %c0_23 = arith.constant 0 : index
    %33 = vector.load %arg2[%c3, %c0_22, %c0_23] : memref<5x128x128xbf16, #tpu.memory_space<vmem>>, vector<1x128x128xbf16>
    %34 = vector.shape_cast %33 : vector<1x128x128xbf16> to vector<128x128xbf16>
    %cst_24 = arith.constant dense<0.000000e+00> : vector<128x128xf32>
    %35 = tpu.matmul %32, %34, %cst_24 {dimension_numbers = #tpu.dot_dimension_numbers<[1], [0], [0], [1], [0, 0, 1, 1], [], []>} : vector<128x128xbf16>, vector<128x128xbf16>, vector<128x128xf32> -> vector<128x128xf32>
    %c3_25 = arith.constant 3 : index
    %c0_26 = arith.constant 0 : index
    %c0_27 = arith.constant 0 : index
    %36 = vector.load %arg3[%c3_25, %c0_26, %c0_27] : memref<5x1x128xf32, #tpu.memory_space<vmem>>, vector<1x1x128xf32>
    %37 = vector.shape_cast %36 : vector<1x1x128xf32> to vector<1x128xf32>
    %38 = vector.broadcast %37 : vector<1x128xf32> to vector<128x128xf32>
    %39 = arith.addf %35, %38 : vector<128x128xf32>
    %cst_28 = arith.constant 0.000000e+00 : f32
    %40 = vector.broadcast %cst_28 : f32 to vector<128x128xf32>
    %41 = arith.maximumf %39, %40 : vector<128x128xf32>
    %42 = arith.truncf %41 : vector<128x128xf32> to vector<128x128xbf16>
    %c4 = arith.constant 4 : index
    %c0_29 = arith.constant 0 : index
    %c0_30 = arith.constant 0 : index
    %43 = vector.load %arg2[%c4, %c0_29, %c0_30] : memref<5x128x128xbf16, #tpu.memory_space<vmem>>, vector<1x128x128xbf16>
    %44 = vector.shape_cast %43 : vector<1x128x128xbf16> to vector<128x128xbf16>
    %cst_31 = arith.constant dense<0.000000e+00> : vector<128x128xf32>
    %45 = tpu.matmul %42, %44, %cst_31 {dimension_numbers = #tpu.dot_dimension_numbers<[1], [0], [0], [1], [0, 0, 1, 1], [], []>} : vector<128x128xbf16>, vector<128x128xbf16>, vector<128x128xf32> -> vector<128x128xf32>
    %c4_32 = arith.constant 4 : index
    %c0_33 = arith.constant 0 : index
    %c0_34 = arith.constant 0 : index
    %46 = vector.load %arg3[%c4_32, %c0_33, %c0_34] : memref<5x1x128xf32, #tpu.memory_space<vmem>>, vector<1x1x128xf32>
    %47 = vector.shape_cast %46 : vector<1x1x128xf32> to vector<1x128xf32>
    %48 = vector.broadcast %47 : vector<1x128xf32> to vector<128x128xf32>
    %49 = arith.addf %45, %48 : vector<128x128xf32>
    %cst_35 = arith.constant 0.000000e+00 : f32
    %50 = vector.broadcast %cst_35 : f32 to vector<128x128xf32>
    %51 = arith.maximumf %49, %50 : vector<128x128xf32>
    %52 = arith.truncf %51 : vector<128x128xf32> to vector<128x128xbf16>
    %c0_36 = arith.constant 0 : index
    %c0_37 = arith.constant 0 : index
    %53 = vector.load %arg4[%c0_36, %c0_37] : memref<128x128xbf16, #tpu.memory_space<vmem>>, vector<128x128xbf16>
    tpu.vector_store %arg4[%c0_36, %c0_37], %52 {strides = array<i32>} : memref<128x128xbf16, #tpu.memory_space<vmem>>, vector<128x128xbf16>,
    return
  }
  func.func @transform_0(%arg0: i32) -> (i32, i32) {
    %c0_i32 = arith.constant 0 : i32
    %c0_i32_0 = arith.constant 0 : i32
    return %arg0, %c0_i32 : i32, i32
  }
  func.func @transform_1(%arg0: i32) -> (i32, i32, i32) {
    %c0_i32 = arith.constant 0 : i32
    %c0_i32_0 = arith.constant 0 : i32
    %c0_i32_1 = arith.constant 0 : i32
    %c0_i32_2 = arith.constant 0 : i32
    return %c0_i32, %c0_i32_0, %c0_i32_1 : i32, i32, i32
  }
  func.func @transform_2(%arg0: i32) -> (i32, i32, i32) {
    %c0_i32 = arith.constant 0 : i32
    %c0_i32_0 = arith.constant 0 : i32
    %c0_i32_1 = arith.constant 0 : i32
    %c0_i32_2 = arith.constant 0 : i32
    return %c0_i32, %c0_i32_0, %c0_i32_1 : i32, i32, i32
  }
  func.func @transform_3(%arg0: i32) -> (i32, i32) {
    %c0_i32 = arith.constant 0 : i32
    %c0_i32_0 = arith.constant 0 : i32
    return %arg0, %c0_i32 : i32, i32
  }
}

</mosaic_0001>

<bundles_post_ra>
// kernel: dnn_forward.1
= control target key start
LH: loop header
LB: loop body
LE: loop exit
PB: predicated region body
PF: predicated region fallthrough
CT: control target
= control target key end

     0   :  { %8 = vsyncpa [#allocation3], 0  ;;  %s1978_s0 = inlined_call_operand.hbm [shape: bf16[256,128], index: 0, kind: input, shape index: {}]   ;;  %s1979_s1 = inlined_call_operand.hbm [shape: bf16[5,128,128], index: 1, kind: input, shape index: {}]   ;;  %s1980_s2 = inlined_call_operand.hbm [shape: f32[5,1,128], index: 2, kind: input, shape index: {}]   ;;  %s1981_s3 = inlined_call_operand.hbm [shape: bf16[256,128], index: 3, kind: output, shape index: {}]  }
   0x1   :  { %10 = vsyncpa [#allocation3 + $0x1], 0 }
   0x2   :  { %11 = vsyncpa [#allocation6], 0 }
   0x3   :  { %12 = vsyncpa [#allocation4], 0 }
   0x4   :  { %14 = vsyncpa [#allocation4 + $0x1], 0  ;;  %s1734_s12 = smov 0   ;;  %s1736_s13 = smov 0  }
   0x5   :  { %s1738_s14 = smov 0   ;;  %s1740_s15 = smov 0  }
   0x6 LB: > { %s1755_s16 = sadd.s32 4294967295, %s1704_s15   ;;  %s1135_s17 = sadd.s32 4294967294, %s1704_s15   ;;  %s1704_s15 = sphi %s1740_s15, %s1991_s15   ;;  %s1700_s14 = sphi %s1738_s14, %s1990_s14   ;;  %s1696_s13 = sphi %s1736_s13, %s1989_s13   ;;  %s1692_s12 = sphi %s1734_s12, %s1988_s12  }
   0x7   : > { %p40_p0 = scmp.ne.s32.totalorder %s1696_s13, %s1692_s12  ;;  %p41_p1 = scmp.eq.s32.totalorder %s1755_s16, 0 }
   0x8   : > { %p106_p2 = scmp.eq.s32.totalorder %s1755_s16, 1  ;;  %p112_p3 = scmp.eq.s32.totalorder %s1135_s17, 1 }
   0x9   : > { %p1764_p4 = por %p41_p1, %p40_p0  ;;  %p1136_p5 = scmp.ge.s32.totalorder %s1704_s15, 1 }
   0xa   : > { %p1769_p6 = por %p112_p3, %p40_p0  ;;  %p119_p7 = scmp.lt.s32.totalorder %s1704_s15, 3 }
   0xb   : > { %s130_s22 = sshll.u32 %s1979_s1, 4  ;;  %s1706_s24 = smov [#allocation5]   ;;  %s131_s22 = int_to_ptr.hbm [resolvable:$true] %s130_s22 }
   0xc   : > { %p1777_p8 = pnand %p1136_p5, %p119_p7  ;;  %s132_s25 = sshll.u32 %s1706_s24, 4  ;;  %s133_s25 = int_to_ptr.vmem [resolvable:$true] %s132_s25 }
   0xd   : > { %s144_s28 = sshll.u32 %s1980_s2, 4  ;;  %s1707_s29 = smov 64   ;;  %s145_s28 = int_to_ptr.hbm [resolvable:$true] %s144_s28 }
   0xe   : > { %p1478_p9 = pneg %p1777_p8  ;;  %s1708_s30 = smov 4  }
   0xf   : > { %s1709_s4 = smov [#allocation7]   ;;  %s1710_s6 = smov 16  }
  0x10   : > { %p1479_p10 = pnand %p1478_p9, %p41_p1  ;;  %s146_s5 = sshll.u32 %s1709_s4, 4  ;;  %s147_s5 = int_to_ptr.vmem [resolvable:$true] %s146_s5 }
  0x11   : > { %s1711_s7 = smov 1   ;;  %s1793_s8 = sadd.s32 1, %s1704_s15  }
  0x12   : > { %1481 = dma.hbm_to_vmem [thread:$0]  (!%p1479_p10), %s131_s22, 5120, %s133_s25, [#allocation6], %s1707_s29, %s1707_s29, %s1708_s30  }
  0x13   : > { %1484 = dma.hbm_to_vmem [thread:$0]  (!%p1479_p10), %s145_s28, 80, %s147_s5, [#allocation6], %s1710_s6, %s1710_s6, %s1711_s7  }
  0x14   : > { %s24_s9 = ssub.s32 %s1704_s15, %s1793_s8  ;;  %s27_s10 = sadd.s32 1, %s1700_s14 }
  0x15   : > { %p25_p12 = scmp.eq.s32.totalorder %s24_s9, 0  ;;  %p34_p13 = scmp.ne.s32.totalorder %s1700_s14, %s1696_s13 }
  0x16   : > { %p35_p0 = scmp.eq.s32.totalorder %s1704_s15, 0  ;;  %p1495_p7 = scmp.lt.s32.totalorder %s1704_s15, 2 }
  0x17   : > { %s1802_s11 = scalar_select %p25_p12, %s1700_s14, %s27_s10  }
  0x18   : > { %p36_p3 = por %p35_p0, %p34_p13  ;;  %p1806_p5 = por %p106_p2, %p34_p13 }
  0x19   : > { %s160_s20 = sand.u32 1, %s1700_s14   ;;  %s1345_s22 = sshll.u32 %s1704_s15, 6 }
  0x1a   : > { %s1140_s21 = sshll.u32 %s160_s20, 6  ;;  %s169_s26 = scalar_lea.hbm %s1978_s0, %s1345_s22 }
  0x1b   : > { %s164_s27 = scalar_lea.vmem [#allocation2], %s1140_s21  ;;  %s170_s4 = sshll.u32 %s169_s26, 4  ;;  %s171_s4 = int_to_ptr.hbm [resolvable:$true] %s170_s4 }
  0x1c   : > { %s172_s28 = sshll.u32 %s164_s27, 4  ;;  %p1816_p9 = pnand %p1495_p7, %p36_p3  ;;  %s173_s28 = int_to_ptr.vmem [resolvable:$true] %s172_s28 }
  0x1d   : > { %s161_s6 = scalar_lea.sflag [#allocation3], %s160_s20  ;;  %s1604_s7 = sshra.s32 %s171_s4, 4  ;;  %s1605_s7 = int_to_ptr.hbm [resolvable:$true] %s1604_s7 }
  0x1e   : > { %s1606_s9 = scalar_lea.hbm %s1605_s7, 64  ;;  %p1608_p10 = pneg %p1816_p9 }
  0x1f   : > { %p1607_p2 = scmp.ne.s32.totalorder %s1605_s7, %s1606_s9  ;;  %s1611_s22 = scalar_lea.hbm %s1978_s0, 128 }
  0x20   : > { %p1612_p0 = scmp.lt.s32.totalorder %s1605_s7, %s1978_s0  ;;  %p1613_p3 = scmp.lt.s32.totalorder %s1611_s22, %s1606_s9 }
  0x21   : > { %p1609_p12 = pnand %p1608_p10, %p1607_p2 }
  0x22   : > { %p1614_p7 = por %p1613_p3, %p1612_p0 }
  0x23   : > { %p1610_p13 = pneg %p1609_p12 }
  0x25   : > { %p1615_p11 = pnand %p1614_p7, %p1610_p13 }
  0x27   : > { %1618 = shalt.err (!%p1615_p11)
}
  0x28   : > { %1488 = dma.hbm_to_vmem [thread:$0]  (!%p1816_p9), %s171_s4, 1024, %s173_s28, %s161_s6, %s1707_s29, %s1707_s29, %s1708_s30  }
  0x29   : > { %184 = sbr.rel (%p1777_p8) target bundleno = 909 (0x38d), region = 32  ;;  %s1836_s20 = sand.u32 (!%p1777_p8), 1, %s1696_s13  }
  0x2a   : > { %s1144_s26 = sshll.u32 (!%p1777_p8), %s1836_s20, 6  ;;  %s187_s27 = scalar_lea.sflag (!%p1777_p8), [#allocation3], %s1836_s20 }
  0x2b   : > { %s1842_s7 = scalar_lea.vmem (!%p1777_p8), [#allocation2], %s1144_s26 }
  0x2e   : > { %1679 = dma.done.wait (%p1764_p4), %s187_s27, 1024  }
  0x2f   : > { %1681 = vsyncadd (%p1764_p4), %s187_s27, 4294966272 }
  0x30   : > { %1683 = dma.done.wait (%p41_p1), [#allocation6], 5200  }
  0x31   : > { %1685 = vsyncadd (%p41_p1), [#allocation6], 4294962096  ;;  %v1361_v0 = vld [vmem:[#allocation5 + $0x38] sm:$0xff]  ;;  %v1360_v1 = vld [vmem:[#allocation5 + $0x30] sm:$0xff]  ;;  %s1920_s18 = scalar_lea.vmem [#allocation8], %s1144_s26  ;;  %s1394_s23 = sshll.u32 %s1755_s16, 6 }
  0x32   : > { %358 = vmatpush.bf16.msra.mxu0 %v1361_v0  ;;  %1442 = vmatpush.bf16.msra.mxu1 %v1361_v0  ;;  %v1359_v2 = vld [vmem:[#allocation5 + $0x28] sm:$0xff]  ;;  %v1358_v3 = vld [vmem:[#allocation5 + $0x20] sm:$0xff]  ;;  %v1357_v4 = vld [vmem:[#allocation5 + $0x18] sm:$0xff]  ;;  %s1039_s28 = scalar_lea.hbm %s1981_s3, %s1394_s23  ;;  %s1040_s4 = sshll.u32 %s1920_s18, 4  ;;  %s1041_s4 = int_to_ptr.vmem [resolvable:$true] %s1040_s4 }
  0x33   : > { %1443 = vmatpush.bf16.msra.mxu2 %v1361_v0  ;;  %1444 = vmatpush.bf16.msra.mxu3 %v1361_v0  ;;  %v1356_v5 = vld [vmem:[#allocation5 + $0x10] sm:$0xff]  ;;  %v1355_v6 = vld [vmem:[#allocation5 + $0x8] sm:$0xff]  ;;  %v1354_v7 = vld [vmem:[#allocation5] sm:$0xff]  ;;  %s1042_s5 = sshll.u32 %s1039_s28, 4  ;;  %s1028_s6 = scalar_lea.sflag [#allocation4], %s1836_s20  ;;  %s1043_s5 = int_to_ptr.hbm [resolvable:$true] %s1042_s5 }
  0x34   : > { %v1369_v8 = vld [vmem:[#allocation5 + $0x78] sm:$0xff]  ;;  %v1346_v9 = vld [vmem:[%s1842_s7] sm:$0xff]  ;;  %v1348_v10 = vld [vmem:[%s1842_s7 + $0x10] sm:$0xff]  ;;  %s1648_s16 = sshra.s32 %s1043_s5, 4  ;;  %s1654_s22 = scalar_lea.hbm %s1981_s3, 128  ;;  %s1649_s16 = int_to_ptr.hbm [resolvable:$true] %s1648_s16 }
  0x35   : > { %v1350_v11 = vld [vmem:[%s1842_s7 + $0x20] sm:$0xff]  ;;  %v1352_v12 = vld [vmem:[%s1842_s7 + $0x30] sm:$0xff]  ;;  %v1367_v14 = vld [vmem:[#allocation5 + $0x68] sm:$0xff]  ;;  %s1650_s9 = scalar_lea.hbm %s1649_s16, 64  ;;  %p1655_p11 = scmp.lt.s32.totalorder %s1649_s16, %s1981_s3 }
  0x36   : > { %359 = vmatpush.bf16.msra.mxu0 %v1360_v1  ;;  %1445 = vmatpush.bf16.msra.mxu1 %v1360_v1  ;;  %v1368_v13 = vld [vmem:[#allocation5 + $0x70] sm:$0xff]  ;;  %v1366_v15 = vld [vmem:[#allocation5 + $0x60] sm:$0xff]  ;;  %v1365_v16 = vld [vmem:[#allocation5 + $0x58] sm:$0xff]  ;;  %p1651_p1 = scmp.ne.s32.totalorder %s1649_s16, %s1650_s9  ;;  %p1656_p9 = scmp.lt.s32.totalorder %s1654_s22, %s1650_s9 }
  0x37   : > { %1446 = vmatpush.bf16.msra.mxu2 %v1360_v1  ;;  %1447 = vmatpush.bf16.msra.mxu3 %v1360_v1  ;;  %v1347_v17 = vld [vmem:[%s1842_s7 + $0x8] sm:$0xff]  ;;  %v1349_v18 = vld [vmem:[%s1842_s7 + $0x18] sm:$0xff]  ;;  %v1364_v21 = vld [vmem:[#allocation5 + $0x50] sm:$0xff] }
  0x38   : > { %v1351_v19 = vld [vmem:[%s1842_s7 + $0x28] sm:$0xff]  ;;  %v1353_v20 = vld [vmem:[%s1842_s7 + $0x38] sm:$0xff]  ;;  %v1362_v23 = vld [vmem:[#allocation5 + $0x40] sm:$0xff]  ;;  %p1652_p4 = pnand %p1651_p1, %p1806_p5  ;;  %p1657_p2 = por %p1656_p9, %p1655_p11 }
  0x39   : > { %v1363_v22 = vld [vmem:[#allocation5 + $0x48] sm:$0xff]  ;;  %v1860_v25 = vld [vmem:[#allocation7] ss:$0 sm:$0xff]  ;;  %v1377_v61 = vld [vmem:[#allocation5 + $0xb8] sm:$0xff] }
  0x3a   : > { %360 = vmatpush.bf16.msra.mxu0 %v1359_v2  ;;  %1448 = vmatpush.bf16.msra.mxu1 %v1359_v2  ;;  %p1653_p8 = pneg %p1652_p4 }
  0x3b   : > { %1449 = vmatpush.bf16.msra.mxu2 %v1359_v2  ;;  %1450 = vmatpush.bf16.msra.mxu3 %v1359_v2 }
  0x3c   : > { %p1658_p10 = pnand %p1657_p2, %p1653_p8 }
  0x3e   : > { %361 = vmatpush.bf16.msra.mxu0 %v1358_v3  ;;  %1451 = vmatpush.bf16.msra.mxu1 %v1358_v3 }
  0x3f   : > { %1452 = vmatpush.bf16.msra.mxu2 %v1358_v3  ;;  %1453 = vmatpush.bf16.msra.mxu3 %v1358_v3 }
  0x42   : > { %362 = vmatpush.bf16.msra.mxu0 %v1357_v4  ;;  %1454 = vmatpush.bf16.msra.mxu1 %v1357_v4 }
  0x43   : > { %1455 = vmatpush.bf16.msra.mxu2 %v1357_v4  ;;  %1456 = vmatpush.bf16.msra.mxu3 %v1357_v4 }
  0x46   : > { %363 = vmatpush.bf16.msra.mxu0 %v1356_v5  ;;  %1457 = vmatpush.bf16.msra.mxu1 %v1356_v5 }
  0x47   : > { %1458 = vmatpush.bf16.msra.mxu2 %v1356_v5  ;;  %1459 = vmatpush.bf16.msra.mxu3 %v1356_v5 }
  0x4a   : > { %364 = vmatpush.bf16.msra.mxu0 %v1355_v6  ;;  %1460 = vmatpush.bf16.msra.mxu1 %v1355_v6 }
  0x4b   : > { %1461 = vmatpush.bf16.msra.mxu2 %v1355_v6  ;;  %1462 = vmatpush.bf16.msra.mxu3 %v1355_v6  ;;  %v1376_v6 = vld [vmem:[#allocation5 + $0xb0] sm:$0xff] }
  0x4e   : > { %365 = vmatpush.bf16.msra.mxu0 %v1354_v7  ;;  %1463 = vmatpush.bf16.msra.mxu1 %v1354_v7 }
  0x4f   : > { %1464 = vmatpush.bf16.msra.mxu2 %v1354_v7  ;;  %1465 = vmatpush.bf16.msra.mxu3 %v1354_v7  ;;  %v1375_v7 = vld [vmem:[#allocation5 + $0xa8] sm:$0xff] }
  0x51   : > { %366 = vmatmul.bf16.vlgmr.msra.gmra.mxu0 %v1346_v9  ;;  %376 = vmatmul.bf16.vlgmr.msra.gmra.mxu1 %v1348_v10 }
  0x52   : > { %501 = vmatpush.bf16.msrb.mxu1 %v1369_v8  ;;  %386 = vmatmul.bf16.vlgmr.msra.gmra.mxu2 %v1350_v11  ;;  %v1374_v8 = vld [vmem:[#allocation5 + $0xa0] sm:$0xff] }
  0x53   : > { %396 = vmatmul.bf16.vlgmr.msra.gmra.mxu3 %v1352_v12  ;;  %644 = vmatpush.bf16.msrb.mxu2 %v1377_v61  ;;  %v1373_v12 = vld [vmem:[#allocation5 + $0x98] sm:$0xff] }
  0x56   : > { %502 = vmatpush.bf16.msrb.mxu1 %v1368_v13 }
  0x57   : > { %645 = vmatpush.bf16.msrb.mxu2 %v1376_v6  ;;  %v1384_v6 = vld [vmem:[#allocation5 + $0xf0] sm:$0xff] }
  0x5a   : > { %503 = vmatpush.bf16.msrb.mxu1 %v1367_v14 }
  0x5b   : > { %646 = vmatpush.bf16.msrb.mxu2 %v1375_v7  ;;  %v1383_v7 = vld [vmem:[#allocation5 + $0xe8] sm:$0xff] }
  0x5e   : > { %504 = vmatpush.bf16.msrb.mxu1 %v1366_v15 }
  0x5f   : > { %647 = vmatpush.bf16.msrb.mxu2 %v1374_v8 }
  0x61   : > { %371 = vmatmul.bf16.gmra.mxu0 %v1347_v17  ;;  %381 = vmatmul.bf16.gmra.mxu1 %v1349_v18  ;;  %v1371_v17 = vld [vmem:[#allocation5 + $0x88] sm:$0xff] }
  0x62   : > { %505 = vmatpush.bf16.msrb.mxu1 %v1365_v16  ;;  %391 = vmatmul.bf16.gmra.mxu2 %v1351_v19  ;;  %v1372_v16 = vld [vmem:[#allocation5 + $0x90] sm:$0xff] }
  0x63   : > { %401 = vmatmul.bf16.gmra.mxu3 %v1353_v20  ;;  %648 = vmatpush.bf16.msrb.mxu2 %v1373_v12 }
  0x66   : > { %506 = vmatpush.bf16.msrb.mxu1 %v1364_v21  ;;  %v1370_v21 = vld [vmem:[#allocation5 + $0x80] sm:$0xff] }
  0x67   : > { %649 = vmatpush.bf16.msrb.mxu2 %v1372_v16 }
  0x6a   : > { %507 = vmatpush.bf16.msrb.mxu1 %v1363_v22 }
  0x6b   : > { %650 = vmatpush.bf16.msrb.mxu2 %v1371_v17  ;;  %v1380_v17 = vld [vmem:[#allocation5 + $0xd0] sm:$0xff] }
  0x6e   : > { %508 = vmatpush.bf16.msrb.mxu1 %v1362_v23 }
  0x6f   : > { %651 = vmatpush.bf16.msrb.mxu2 %v1370_v21 }
  0xce   : > { %v367_v24 = vpop.f32.mrf.mxu0  ;;  %v377_v33 = vpop.f32.mrf.mxu1 }
  0xcf   : > { %v368_v26 = vadd.f32 %v1860_v25, %v367_v24  ;;  %v378_v41 = vadd.f32 %v1860_v25, %v377_v33 }
  0xd1   : > { %v407_v29 = vmax.f32 %v368_v26, 0.0  ;;  %v411_v44 = vmax.f32 %v378_v41, 0.0 }
  0xd5   : > { %v387_v48 = vpop.f32.mrf.mxu2 }
  0xd6   : > { %v369_v27 = vpop.f32.mrf.mxu0  ;;  %v379_v40 = vpop.f32.mrf.mxu1  ;;  %v388_v55 = vadd.f32 %v1860_v25, %v387_v48 }
  0xd7   : > { %v370_v28 = vadd.f32 %v1860_v25, %v369_v27  ;;  %v380_v42 = vadd.f32 %v1860_v25, %v379_v40  ;;  %v397_v63 = vpop.f32.mrf.mxu3  ;;  %v1878_v27 = vld [vmem:[#allocation7 + $0x1] ss:$0 sm:$0xff] }
  0xd8   : > { %v415_v58 = vmax.f32 %v388_v55, 0.0  ;;  %v398_v9 = vadd.f32 %v1860_v25, %v397_v63 }
  0xd9   : > { %v408_v30 = vmax.f32 %v370_v28, 0.0  ;;  %v412_v45 = vmax.f32 %v380_v42, 0.0 }
  0xda   : > { %v419_v13 = vmax.f32 %v398_v9, 0.0 }
  0xdb   : > { %v423_v31 = vpack.c.bf16 %v408_v30, %v407_v29  ;;  %v425_v46 = vpack.c.bf16 %v412_v45, %v411_v44 }
  0xdd   : > { %509 = vmatmul.bf16.vlgmr.msrb.gmra.mxu1 %v423_v31  ;;  %v389_v54 = vpop.f32.mrf.mxu2 }
  0xde   : > { %v372_v32 = vpop.f32.mrf.mxu0  ;;  %v382_v43 = vpop.f32.mrf.mxu1  ;;  %v390_v56 = vadd.f32 %v1860_v25, %v389_v54 }
  0xdf   : > { %v373_v34 = vadd.f32 %v1860_v25, %v372_v32  ;;  %v383_v49 = vadd.f32 %v1860_v25, %v382_v43  ;;  %v399_v5 = vpop.f32.mrf.mxu3 }
  0xe0   : > { %v416_v59 = vmax.f32 %v390_v56, 0.0  ;;  %v400_v10 = vadd.f32 %v1860_v25, %v399_v5 }
  0xe1   : > { %v409_v37 = vmax.f32 %v373_v34, 0.0  ;;  %v413_v51 = vmax.f32 %v383_v49, 0.0 }
  0xe2   : > { %v427_v60 = vpack.c.bf16 %v416_v59, %v415_v58  ;;  %v420_v14 = vmax.f32 %v400_v10, 0.0 }
  0xe4   : > { %v429_v15 = vpack.c.bf16 %v420_v14, %v419_v13 }
  0xe5   : > { %v392_v57 = vpop.f32.mrf.mxu2 }
  0xe6   : > { %v374_v35 = vpop.f32.mrf.mxu0  ;;  %v384_v47 = vpop.f32.mrf.mxu1  ;;  %v393_v0 = vadd.f32 %v1860_v25, %v392_v57 }
  0xe7   : > { %v375_v36 = vadd.f32 %v1860_v25, %v374_v35  ;;  %v385_v50 = vadd.f32 %v1860_v25, %v384_v47  ;;  %v402_v11 = vpop.f32.mrf.mxu3 }
  0xe8   : > { %v417_v2 = vmax.f32 %v393_v0, 0.0  ;;  %v403_v19 = vadd.f32 %v1860_v25, %v402_v11  ;;  %v1382_v11 = vld [vmem:[#allocation5 + $0xe0] sm:$0xff] }
  0xe9   : > { %v410_v38 = vmax.f32 %v375_v36, 0.0  ;;  %v414_v52 = vmax.f32 %v385_v50, 0.0 }
  0xea   : > { %v421_v22 = vmax.f32 %v403_v19, 0.0 }
  0xeb   : > { %v424_v39 = vpack.c.bf16 %v410_v38, %v409_v37  ;;  %v426_v53 = vpack.c.bf16 %v414_v52, %v413_v51 }
  0xed   : > { %514 = vmatmul.bf16.gmra.mxu1 %v424_v39  ;;  %v394_v62 = vpop.f32.mrf.mxu2 }
  0xee   : > { %v395_v1 = vadd.f32 %v1860_v25, %v394_v62 }
  0xef   : > { %v404_v18 = vpop.f32.mrf.mxu3 }
  0xf0   : > { %v418_v3 = vmax.f32 %v395_v1, 0.0  ;;  %v405_v20 = vadd.f32 %v1860_v25, %v404_v18  ;;  %v1379_v18 = vld [vmem:[#allocation5 + $0xc8] sm:$0xff] }
  0xf2   : > { %v428_v4 = vpack.c.bf16 %v418_v3, %v417_v2  ;;  %v422_v23 = vmax.f32 %v405_v20, 0.0 }
  0xf4   : > { %v430_v24 = vpack.c.bf16 %v422_v23, %v421_v22 }
  0xfd   : > { %519 = vmatmul.bf16.gmra.mxu1 %v425_v46 }
 0x10d   : > { %524 = vmatmul.bf16.gmra.mxu1 %v426_v53 }
 0x11d   : > { %529 = vmatmul.bf16.gmra.mxu1 %v427_v60 }
 0x12d   : > { %534 = vmatmul.bf16.gmra.mxu1 %v428_v4  ;;  %v1385_v4 = vld [vmem:[#allocation5 + $0xf8] sm:$0xff] }
 0x12e   : > { %787 = vmatpush.bf16.msrb.mxu3 %v1385_v4 }
 0x132   : > { %788 = vmatpush.bf16.msrb.mxu3 %v1384_v6 }
 0x136   : > { %789 = vmatpush.bf16.msrb.mxu3 %v1383_v7  ;;  %v1392_v7 = vld [vmem:[#allocation5 + $0x130] sm:$0xff] }
 0x13a   : > { %790 = vmatpush.bf16.msrb.mxu3 %v1382_v11 }
 0x13d   : > { %539 = vmatmul.bf16.gmra.mxu1 %v429_v15  ;;  %v1381_v15 = vld [vmem:[#allocation5 + $0xd8] sm:$0xff] }
 0x13e   : > { %791 = vmatpush.bf16.msrb.mxu3 %v1381_v15 }
 0x142   : > { %792 = vmatpush.bf16.msrb.mxu3 %v1380_v17 }
 0x146   : > { %793 = vmatpush.bf16.msrb.mxu3 %v1379_v18  ;;  %v1388_v18 = vld [vmem:[#allocation5 + $0x110] sm:$0xff] }
 0x14d   : > { %544 = vmatmul.bf16.gmra.mxu1 %v430_v24  ;;  %v1378_v24 = vld [vmem:[#allocation5 + $0xc0] sm:$0xff] }
 0x14e   : > { %794 = vmatpush.bf16.msrb.mxu3 %v1378_v24 }
 0x15a   : > { %v510_v26 = vpop.f32.mrf.mxu1 }
 0x15b   : > { %v511_v28 = vadd.f32 %v1878_v27, %v510_v26 }
 0x15d   : > { %v550_v31 = vmax.f32 %v511_v28, 0.0 }
 0x162   : > { %v512_v29 = vpop.f32.mrf.mxu1 }
 0x163   : > { %v513_v30 = vadd.f32 %v1878_v27, %v512_v29  ;;  %v1896_v29 = vld [vmem:[#allocation7 + $0x2] ss:$0 sm:$0xff] }
 0x165   : > { %v551_v32 = vmax.f32 %v513_v30, 0.0 }
 0x167   : > { %v566_v33 = vpack.c.bf16 %v551_v32, %v550_v31 }
 0x169   : > { %652 = vmatmul.bf16.vlgmr.msrb.gmra.mxu2 %v566_v33 }
 0x16a   : > { %v515_v34 = vpop.f32.mrf.mxu1 }
 0x16b   : > { %v516_v25 = vadd.f32 %v1878_v27, %v515_v34 }
 0x16d   : > { %v552_v37 = vmax.f32 %v516_v25, 0.0 }
 0x172   : > { %v517_v35 = vpop.f32.mrf.mxu1 }
 0x173   : > { %v518_v36 = vadd.f32 %v1878_v27, %v517_v35 }
 0x175   : > { %v553_v38 = vmax.f32 %v518_v36, 0.0 }
 0x177   : > { %v567_v39 = vpack.c.bf16 %v553_v38, %v552_v37 }
 0x179   : > { %657 = vmatmul.bf16.gmra.mxu2 %v567_v39 }
 0x17a   : > { %v520_v40 = vpop.f32.mrf.mxu1 }
 0x17b   : > { %v521_v41 = vadd.f32 %v1878_v27, %v520_v40 }
 0x17d   : > { %v554_v44 = vmax.f32 %v521_v41, 0.0 }
 0x182   : > { %v522_v42 = vpop.f32.mrf.mxu1 }
 0x183   : > { %v523_v43 = vadd.f32 %v1878_v27, %v522_v42 }
 0x185   : > { %v555_v45 = vmax.f32 %v523_v43, 0.0 }
 0x187   : > { %v568_v46 = vpack.c.bf16 %v555_v45, %v554_v44 }
 0x189   : > { %662 = vmatmul.bf16.gmra.mxu2 %v568_v46 }
 0x18a   : > { %v525_v47 = vpop.f32.mrf.mxu1 }
 0x18b   : > { %v526_v48 = vadd.f32 %v1878_v27, %v525_v47 }
 0x18d   : > { %v556_v51 = vmax.f32 %v526_v48, 0.0 }
 0x192   : > { %v527_v49 = vpop.f32.mrf.mxu1 }
 0x193   : > { %v528_v50 = vadd.f32 %v1878_v27, %v527_v49 }
 0x195   : > { %v557_v52 = vmax.f32 %v528_v50, 0.0 }
 0x197   : > { %v569_v53 = vpack.c.bf16 %v557_v52, %v556_v51 }
 0x199   : > { %667 = vmatmul.bf16.gmra.mxu2 %v569_v53 }
 0x19a   : > { %v530_v54 = vpop.f32.mrf.mxu1 }
 0x19b   : > { %v531_v55 = vadd.f32 %v1878_v27, %v530_v54 }
 0x19d   : > { %v558_v58 = vmax.f32 %v531_v55, 0.0 }
 0x1a2   : > { %v532_v56 = vpop.f32.mrf.mxu1 }
 0x1a3   : > { %v533_v57 = vadd.f32 %v1878_v27, %v532_v56 }
 0x1a5   : > { %v559_v59 = vmax.f32 %v533_v57, 0.0 }
 0x1a7   : > { %v570_v60 = vpack.c.bf16 %v559_v59, %v558_v58 }
 0x1a9   : > { %672 = vmatmul.bf16.gmra.mxu2 %v570_v60 }
 0x1aa   : > { %v535_v61 = vpop.f32.mrf.mxu1 }
 0x1ab   : > { %v536_v62 = vadd.f32 %v1878_v27, %v535_v61 }
 0x1ad   : > { %v560_v1 = vmax.f32 %v536_v62, 0.0 }
 0x1b2   : > { %v537_v63 = vpop.f32.mrf.mxu1 }
 0x1b3   : > { %v538_v0 = vadd.f32 %v1878_v27, %v537_v63 }
 0x1b5   : > { %v561_v2 = vmax.f32 %v538_v0, 0.0 }
 0x1b7   : > { %v571_v3 = vpack.c.bf16 %v561_v2, %v560_v1 }
 0x1b9   : > { %677 = vmatmul.bf16.gmra.mxu2 %v571_v3 }
 0x1ba   : > { %v540_v5 = vpop.f32.mrf.mxu1 }
 0x1bb   : > { %v541_v8 = vadd.f32 %v1878_v27, %v540_v5  ;;  %v1393_v5 = vld [vmem:[#allocation5 + $0x138] sm:$0xff] }
 0x1bc   : > { %930 = vmatpush.bf16.msrb.mxu0 %v1393_v5 }
 0x1bd   : > { %v562_v12 = vmax.f32 %v541_v8, 0.0  ;;  %v1391_v8 = vld [vmem:[#allocation5 + $0x128] sm:$0xff] }
 0x1c0   : > { %931 = vmatpush.bf16.msrb.mxu0 %v1392_v7 }
 0x1c2   : > { %v542_v9 = vpop.f32.mrf.mxu1 }
 0x1c3   : > { %v543_v10 = vadd.f32 %v1878_v27, %v542_v9 }
 0x1c4   : > { %932 = vmatpush.bf16.msrb.mxu0 %v1391_v8 }
 0x1c5   : > { %v563_v13 = vmax.f32 %v543_v10, 0.0 }
 0x1c7   : > { %v572_v14 = vpack.c.bf16 %v563_v13, %v562_v12  ;;  %v1390_v12 = vld [vmem:[#allocation5 + $0x120] sm:$0xff] }
 0x1c8   : > { %933 = vmatpush.bf16.msrb.mxu0 %v1390_v12 }
 0x1c9   : > { %682 = vmatmul.bf16.gmra.mxu2 %v572_v14 }
 0x1ca   : > { %v545_v16 = vpop.f32.mrf.mxu1 }
 0x1cb   : > { %v546_v19 = vadd.f32 %v1878_v27, %v545_v16  ;;  %v1389_v16 = vld [vmem:[#allocation5 + $0x118] sm:$0xff] }
 0x1cc   : > { %934 = vmatpush.bf16.msrb.mxu0 %v1389_v16 }
 0x1cd   : > { %v564_v22 = vmax.f32 %v546_v19, 0.0  ;;  %v1387_v19 = vld [vmem:[#allocation5 + $0x108] sm:$0xff] }
 0x1d0   : > { %935 = vmatpush.bf16.msrb.mxu0 %v1388_v18 }
 0x1d2   : > { %v547_v20 = vpop.f32.mrf.mxu1 }
 0x1d3   : > { %v548_v21 = vadd.f32 %v1878_v27, %v547_v20 }
 0x1d4   : > { %936 = vmatpush.bf16.msrb.mxu0 %v1387_v19 }
 0x1d5   : > { %v565_v23 = vmax.f32 %v548_v21, 0.0 }
 0x1d7   : > { %v573_v26 = vpack.c.bf16 %v565_v23, %v564_v22 }
 0x1d9   : > { %687 = vmatmul.bf16.gmra.mxu2 %v573_v26  ;;  %v1386_v26 = vld [vmem:[#allocation5 + $0x100] sm:$0xff] }
 0x1da   : > { %937 = vmatpush.bf16.msrb.mxu0 %v1386_v26 }
 0x1ec   : > { %v653_v28 = vpop.f32.mrf.mxu2 }
 0x1ed   : > { %v654_v30 = vadd.f32 %v1896_v29, %v653_v28 }
 0x1ef   : > { %v693_v33 = vmax.f32 %v654_v30, 0.0 }
 0x1f4   : > { %v655_v31 = vpop.f32.mrf.mxu2 }
 0x1f5   : > { %v656_v32 = vadd.f32 %v1896_v29, %v655_v31  ;;  %v1542_v31 = vld [vmem:[#allocation7 + $0x3] ss:$0 sm:$0xff] }
 0x1f7   : > { %v694_v34 = vmax.f32 %v656_v32, 0.0 }
 0x1f9   : > { %v709_v25 = vpack.c.bf16 %v694_v34, %v693_v33 }
 0x1fb   : > { %795 = vmatmul.bf16.vlgmr.msrb.gmra.mxu3 %v709_v25 }
 0x1fc   : > { %v658_v27 = vpop.f32.mrf.mxu2 }
 0x1fd   : > { %v659_v35 = vadd.f32 %v1896_v29, %v658_v27 }
 0x1ff   : > { %v695_v38 = vmax.f32 %v659_v35, 0.0 }
 0x204   : > { %v660_v36 = vpop.f32.mrf.mxu2 }
 0x205   : > { %v661_v37 = vadd.f32 %v1896_v29, %v660_v36 }
 0x207   : > { %v696_v39 = vmax.f32 %v661_v37, 0.0 }
 0x209   : > { %v710_v40 = vpack.c.bf16 %v696_v39, %v695_v38 }
 0x20b   : > { %800 = vmatmul.bf16.gmra.mxu3 %v710_v40 }
 0x20c   : > { %v663_v41 = vpop.f32.mrf.mxu2 }
 0x20d   : > { %v664_v42 = vadd.f32 %v1896_v29, %v663_v41 }
 0x20f   : > { %v697_v45 = vmax.f32 %v664_v42, 0.0 }
 0x214   : > { %v665_v43 = vpop.f32.mrf.mxu2 }
 0x215   : > { %v666_v44 = vadd.f32 %v1896_v29, %v665_v43 }
 0x217   : > { %v698_v46 = vmax.f32 %v666_v44, 0.0 }
 0x219   : > { %v711_v47 = vpack.c.bf16 %v698_v46, %v697_v45 }
 0x21b   : > { %805 = vmatmul.bf16.gmra.mxu3 %v711_v47 }
 0x21c   : > { %v668_v48 = vpop.f32.mrf.mxu2 }
 0x21d   : > { %v669_v49 = vadd.f32 %v1896_v29, %v668_v48 }
 0x21f   : > { %v699_v52 = vmax.f32 %v669_v49, 0.0 }
 0x224   : > { %v670_v50 = vpop.f32.mrf.mxu2 }
 0x225   : > { %v671_v51 = vadd.f32 %v1896_v29, %v670_v50 }
 0x227   : > { %v700_v53 = vmax.f32 %v671_v51, 0.0 }
 0x229   : > { %v712_v54 = vpack.c.bf16 %v700_v53, %v699_v52 }
 0x22b   : > { %810 = vmatmul.bf16.gmra.mxu3 %v712_v54 }
 0x22c   : > { %v673_v55 = vpop.f32.mrf.mxu2 }
 0x22d   : > { %v674_v56 = vadd.f32 %v1896_v29, %v673_v55 }
 0x22f   : > { %v701_v59 = vmax.f32 %v674_v56, 0.0 }
 0x234   : > { %v675_v57 = vpop.f32.mrf.mxu2 }
 0x235   : > { %v676_v58 = vadd.f32 %v1896_v29, %v675_v57 }
 0x237   : > { %v702_v60 = vmax.f32 %v676_v58, 0.0 }
 0x239   : > { %v713_v61 = vpack.c.bf16 %v702_v60, %v701_v59 }
 0x23b   : > { %815 = vmatmul.bf16.gmra.mxu3 %v713_v61 }
 0x23c   : > { %v678_v62 = vpop.f32.mrf.mxu2 }
 0x23d   : > { %v679_v63 = vadd.f32 %v1896_v29, %v678_v62 }
 0x23f   : > { %v703_v2 = vmax.f32 %v679_v63, 0.0 }
 0x244   : > { %v680_v0 = vpop.f32.mrf.mxu2 }
 0x245   : > { %v681_v1 = vadd.f32 %v1896_v29, %v680_v0 }
 0x247   : > { %v704_v3 = vmax.f32 %v681_v1, 0.0 }
 0x249   : > { %v714_v4 = vpack.c.bf16 %v704_v3, %v703_v2 }
 0x24b   : > { %820 = vmatmul.bf16.gmra.mxu3 %v714_v4 }
 0x24c   : > { %v683_v6 = vpop.f32.mrf.mxu2 }
 0x24d   : > { %v684_v9 = vadd.f32 %v1896_v29, %v683_v6 }
 0x24f   : > { %v705_v13 = vmax.f32 %v684_v9, 0.0 }
 0x254   : > { %v685_v10 = vpop.f32.mrf.mxu2 }
 0x255   : > { %v686_v11 = vadd.f32 %v1896_v29, %v685_v10 }
 0x257   : > { %v706_v14 = vmax.f32 %v686_v11, 0.0 }
 0x259   : > { %v715_v15 = vpack.c.bf16 %v706_v14, %v705_v13 }
 0x25b   : > { %825 = vmatmul.bf16.gmra.mxu3 %v715_v15 }
 0x25c   : > { %v688_v17 = vpop.f32.mrf.mxu2 }
 0x25d   : > { %v689_v20 = vadd.f32 %v1896_v29, %v688_v17 }
 0x25f   : > { %v707_v23 = vmax.f32 %v689_v20, 0.0 }
 0x264   : > { %v690_v21 = vpop.f32.mrf.mxu2 }
 0x265   : > { %v691_v22 = vadd.f32 %v1896_v29, %v690_v21  ;;  %v1914_v21 = vld [vmem:[#allocation7 + $0x4] ss:$0 sm:$0xff] }
 0x267   : > { %v708_v24 = vmax.f32 %v691_v22, 0.0 }
 0x269   : > { %v716_v28 = vpack.c.bf16 %v708_v24, %v707_v23 }
 0x26b   : > { %830 = vmatmul.bf16.gmra.mxu3 %v716_v28 }
 0x27e   : > { %v796_v30 = vpop.f32.mrf.mxu3 }
 0x27f   : > { %v797_v32 = vadd.f32 %v1542_v31, %v796_v30 }
 0x281   : > { %v836_v25 = vmax.f32 %v797_v32, 0.0 }
 0x286   : > { %v798_v33 = vpop.f32.mrf.mxu3 }
 0x287   : > { %v799_v34 = vadd.f32 %v1542_v31, %v798_v33 }
 0x289   : > { %v837_v27 = vmax.f32 %v799_v34, 0.0 }
 0x28b   : > { %v852_v35 = vpack.c.bf16 %v837_v27, %v836_v25 }
 0x28d   : > { %938 = vmatmul.bf16.vlgmr.msrb.gmra.mxu0 %v852_v35 }
 0x28e   : > { %v801_v36 = vpop.f32.mrf.mxu3 }
 0x28f   : > { %v802_v37 = vadd.f32 %v1542_v31, %v801_v36 }
 0x291   : > { %v838_v39 = vmax.f32 %v802_v37, 0.0 }
 0x296   : > { %v803_v38 = vpop.f32.mrf.mxu3 }
 0x297   : > { %v804_v29 = vadd.f32 %v1542_v31, %v803_v38 }
 0x299   : > { %v839_v40 = vmax.f32 %v804_v29, 0.0 }
 0x29b   : > { %v853_v41 = vpack.c.bf16 %v839_v40, %v838_v39 }
 0x29d   : > { %943 = vmatmul.bf16.gmra.mxu0 %v853_v41 }
 0x29e   : > { %v806_v42 = vpop.f32.mrf.mxu3 }
 0x29f   : > { %v807_v43 = vadd.f32 %v1542_v31, %v806_v42 }
 0x2a1   : > { %v840_v46 = vmax.f32 %v807_v43, 0.0 }
 0x2a6   : > { %v808_v44 = vpop.f32.mrf.mxu3 }
 0x2a7   : > { %v809_v45 = vadd.f32 %v1542_v31, %v808_v44 }
 0x2a9   : > { %v841_v47 = vmax.f32 %v809_v45, 0.0 }
 0x2ab   : > { %v854_v48 = vpack.c.bf16 %v841_v47, %v840_v46 }
 0x2ad   : > { %948 = vmatmul.bf16.gmra.mxu0 %v854_v48 }
 0x2ae   : > { %v811_v49 = vpop.f32.mrf.mxu3 }
 0x2af   : > { %v812_v50 = vadd.f32 %v1542_v31, %v811_v49 }
 0x2b1   : > { %v842_v53 = vmax.f32 %v812_v50, 0.0 }
 0x2b6   : > { %v813_v51 = vpop.f32.mrf.mxu3 }
 0x2b7   : > { %v814_v52 = vadd.f32 %v1542_v31, %v813_v51 }
 0x2b9   : > { %v843_v54 = vmax.f32 %v814_v52, 0.0 }
 0x2bb   : > { %v855_v55 = vpack.c.bf16 %v843_v54, %v842_v53 }
 0x2bd   : > { %953 = vmatmul.bf16.gmra.mxu0 %v855_v55 }
 0x2be   : > { %v816_v56 = vpop.f32.mrf.mxu3 }
 0x2bf   : > { %v817_v57 = vadd.f32 %v1542_v31, %v816_v56 }
 0x2c1   : > { %v844_v60 = vmax.f32 %v817_v57, 0.0 }
 0x2c6   : > { %v818_v58 = vpop.f32.mrf.mxu3 }
 0x2c7   : > { %v819_v59 = vadd.f32 %v1542_v31, %v818_v58 }
 0x2c9   : > { %v845_v61 = vmax.f32 %v819_v59, 0.0 }
 0x2cb   : > { %v856_v62 = vpack.c.bf16 %v845_v61, %v844_v60 }
 0x2cd   : > { %958 = vmatmul.bf16.gmra.mxu0 %v856_v62 }
 0x2ce   : > { %v821_v63 = vpop.f32.mrf.mxu3 }
 0x2cf   : > { %v822_v0 = vadd.f32 %v1542_v31, %v821_v63 }
 0x2d1   : > { %v846_v3 = vmax.f32 %v822_v0, 0.0 }
 0x2d6   : > { %v823_v1 = vpop.f32.mrf.mxu3 }
 0x2d7   : > { %v824_v2 = vadd.f32 %v1542_v31, %v823_v1 }
 0x2d9   : > { %v847_v4 = vmax.f32 %v824_v2, 0.0 }
 0x2db   : > { %v857_v5 = vpack.c.bf16 %v847_v4, %v846_v3 }
 0x2dd   : > { %963 = vmatmul.bf16.gmra.mxu0 %v857_v5 }
 0x2de   : > { %v826_v6 = vpop.f32.mrf.mxu3 }
 0x2df   : > { %v827_v7 = vadd.f32 %v1542_v31, %v826_v6 }
 0x2e1   : > { %v848_v10 = vmax.f32 %v827_v7, 0.0 }
 0x2e6   : > { %v828_v8 = vpop.f32.mrf.mxu3 }
 0x2e7   : > { %v829_v9 = vadd.f32 %v1542_v31, %v828_v8 }
 0x2e9   : > { %v849_v11 = vmax.f32 %v829_v9, 0.0 }
 0x2eb   : > { %v858_v12 = vpack.c.bf16 %v849_v11, %v848_v10 }
 0x2ed   : > { %968 = vmatmul.bf16.gmra.mxu0 %v858_v12 }
 0x2ee   : > { %v831_v13 = vpop.f32.mrf.mxu3 }
 0x2ef   : > { %v832_v14 = vadd.f32 %v1542_v31, %v831_v13 }
 0x2f1   : > { %v850_v17 = vmax.f32 %v832_v14, 0.0 }
 0x2f6   : > { %v833_v15 = vpop.f32.mrf.mxu3 }
 0x2f7   : > { %v834_v16 = vadd.f32 %v1542_v31, %v833_v15 }
 0x2f9   : > { %v851_v18 = vmax.f32 %v834_v16, 0.0 }
 0x2fb   : > { %v859_v19 = vpack.c.bf16 %v851_v18, %v850_v17 }
 0x2fd   : > { %973 = vmatmul.bf16.gmra.mxu0 %v859_v19 }
 0x30a   : > { %v939_v20 = vpop.f32.mrf.mxu0 }
 0x30b   : > { %v940_v22 = vadd.f32 %v1914_v21, %v939_v20 }
 0x30d   : > { %v979_v26 = vmax.f32 %v940_v22, 0.0 }
 0x312   : > { %v941_v23 = vpop.f32.mrf.mxu0 }
 0x313   : > { %v942_v24 = vadd.f32 %v1914_v21, %v941_v23 }
 0x315   : > { %v980_v28 = vmax.f32 %v942_v24, 0.0 }
 0x317   : > { %v1398_v30 = vpack.c.bf16 %v980_v28, %v979_v26 }
 0x319   : > { %1399 = vst [vmem:[%s1920_s18] sm:$0xff] %v1398_v30  }
 0x31a   : > { %v944_v31 = vpop.f32.mrf.mxu0 }
 0x31b   : > { %v945_v32 = vadd.f32 %v1914_v21, %v944_v31 }
 0x31d   : > { %v981_v25 = vmax.f32 %v945_v32, 0.0 }
 0x322   : > { %v946_v33 = vpop.f32.mrf.mxu0 }
 0x323   : > { %v947_v34 = vadd.f32 %v1914_v21, %v946_v33 }
 0x325   : > { %v982_v27 = vmax.f32 %v947_v34, 0.0 }
 0x327   : > { %v1403_v35 = vpack.c.bf16 %v982_v27, %v981_v25 }
 0x329   : > { %1435 = vst [vmem:[%s1920_s18 + $0x8] sm:$0xff] %v1403_v35  }
 0x32a   : > { %v949_v36 = vpop.f32.mrf.mxu0 }
 0x32b   : > { %v950_v37 = vadd.f32 %v1914_v21, %v949_v36 }
 0x32d   : > { %v983_v39 = vmax.f32 %v950_v37, 0.0 }
 0x332   : > { %v951_v38 = vpop.f32.mrf.mxu0 }
 0x333   : > { %v952_v29 = vadd.f32 %v1914_v21, %v951_v38 }
 0x335   : > { %v984_v40 = vmax.f32 %v952_v29, 0.0 }
 0x337   : > { %v1408_v41 = vpack.c.bf16 %v984_v40, %v983_v39 }
 0x339   : > { %1436 = vst [vmem:[%s1920_s18 + $0x10] sm:$0xff] %v1408_v41  }
 0x33a   : > { %v954_v42 = vpop.f32.mrf.mxu0 }
 0x33b   : > { %v955_v43 = vadd.f32 %v1914_v21, %v954_v42 }
 0x33d   : > { %v985_v46 = vmax.f32 %v955_v43, 0.0 }
 0x342   : > { %v956_v44 = vpop.f32.mrf.mxu0 }
 0x343   : > { %v957_v45 = vadd.f32 %v1914_v21, %v956_v44 }
 0x345   : > { %v986_v47 = vmax.f32 %v957_v45, 0.0 }
 0x347   : > { %v1413_v48 = vpack.c.bf16 %v986_v47, %v985_v46 }
 0x349   : > { %1437 = vst [vmem:[%s1920_s18 + $0x18] sm:$0xff] %v1413_v48  }
 0x34a   : > { %v959_v49 = vpop.f32.mrf.mxu0 }
 0x34b   : > { %v960_v50 = vadd.f32 %v1914_v21, %v959_v49 }
 0x34d   : > { %v987_v53 = vmax.f32 %v960_v50, 0.0 }
 0x352   : > { %v961_v51 = vpop.f32.mrf.mxu0 }
 0x353   : > { %v962_v52 = vadd.f32 %v1914_v21, %v961_v51 }
 0x355   : > { %v988_v54 = vmax.f32 %v962_v52, 0.0 }
 0x357   : > { %v1418_v55 = vpack.c.bf16 %v988_v54, %v987_v53 }
 0x359   : > { %1438 = vst [vmem:[%s1920_s18 + $0x20] sm:$0xff] %v1418_v55  }
 0x35a   : > { %v964_v56 = vpop.f32.mrf.mxu0 }
 0x35b   : > { %v965_v57 = vadd.f32 %v1914_v21, %v964_v56 }
 0x35d   : > { %v989_v60 = vmax.f32 %v965_v57, 0.0 }
 0x362   : > { %v966_v58 = vpop.f32.mrf.mxu0 }
 0x363   : > { %v967_v59 = vadd.f32 %v1914_v21, %v966_v58 }
 0x365   : > { %v990_v61 = vmax.f32 %v967_v59, 0.0 }
 0x367   : > { %v1423_v62 = vpack.c.bf16 %v990_v61, %v989_v60 }
 0x369   : > { %1439 = vst [vmem:[%s1920_s18 + $0x28] sm:$0xff] %v1423_v62  }
 0x36a   : > { %v969_v63 = vpop.f32.mrf.mxu0 }
 0x36b   : > { %v970_v0 = vadd.f32 %v1914_v21, %v969_v63 }
 0x36d   : > { %v991_v3 = vmax.f32 %v970_v0, 0.0 }
 0x372   : > { %v971_v1 = vpop.f32.mrf.mxu0 }
 0x373   : > { %v972_v2 = vadd.f32 %v1914_v21, %v971_v1 }
 0x375   : > { %v992_v4 = vmax.f32 %v972_v2, 0.0 }
 0x377   : > { %v1428_v5 = vpack.c.bf16 %v992_v4, %v991_v3 }
 0x379   : > { %1440 = vst [vmem:[%s1920_s18 + $0x30] sm:$0xff] %v1428_v5  }
 0x37a   : > { %v974_v6 = vpop.f32.mrf.mxu0 }
 0x37b   : > { %v975_v7 = vadd.f32 %v1914_v21, %v974_v6 }
 0x37d   : > { %v993_v10 = vmax.f32 %v975_v7, 0.0 }
 0x382   : > { %v976_v8 = vpop.f32.mrf.mxu0 }
 0x383   : > { %v977_v9 = vadd.f32 %v1914_v21, %v976_v8 }
 0x385   : > { %v994_v11 = vmax.f32 %v977_v9, 0.0 }
 0x387   : > { %v1433_v12 = vpack.c.bf16 %v994_v11, %v993_v10 }
 0x389   : > { %1441 = vst [vmem:[%s1920_s18 + $0x38] sm:$0xff] %v1433_v12  }
 0x38a   : > { %1661 = shalt.err (!%p1658_p10)
}
 0x38b   : > { %s1712_s20 = smov 64   ;;  %s1713_s26 = smov 4  }
 0x38c   : > { %1476 = dma.vmem_to_hbm [thread:$0]  (%p1806_p5), %s1041_s4, 1024, %s1043_s5, %s1028_s6, %s1712_s20, %s1712_s20, %s1713_s26  }
 0x38d PF: > { %s1057_s27 = sand.u32 1, %s1692_s12   ;;  %p1987_p12 = scmp.ge.s32.totalorder %s1704_s15, 2 }
 0x38e   : > { %s1058_s7 = scalar_lea.sflag [#allocation4], %s1057_s27 }
 0x38f   : > { %p1490_p13 = pnand %p1987_p12, %p1769_p6 }
 0x391   : > { %p1491_p0 = pneg %p1490_p13 }
 0x393   : > { %1687 = dma.done.wait (%p1491_p0), %s1058_s7, 1024  }
 0x394   : > { %1689 = vsyncadd (%p1491_p0), %s1058_s7, 4294966272  ;;  %p17_p3 = scmp.ge.s32.totalorder %s1793_s8, 4   ;;  %s1988_s12 = smov %s1696_s13 }
 0x395   : > { %s1989_s13 = smov %s1700_s14  ;;  %s1990_s14 = smov %s1802_s11 }
 0x396   : > { %s1991_s15 = smov %s1793_s8  ;;  %19 = sbr.rel (!%p17_p3) target bundleno = 6 (0x6), region = 93 }
 0x39b   :  { %1064 = vsyncpa [#allocation3], 1 }
 0x39c   :  { %1066 = vsyncpa [#allocation3 + $0x1], 1 }
 0x39d   :  { %1067 = vsyncpa [#allocation6], 1 }
 0x39e   :  { %1068 = vsyncpa [#allocation4], 1 }
 0x39f   :  { %1070 = vsyncpa [#allocation4 + $0x1], 1 }

</bundles_post_ra>
